<compile_context>
chip_gen: v5e
topology: v5e:2x2
jax: 0.10.0
libtpu: 0.0.40
codegen_flags: <defaults>
</compile_context>

<pallas_src>
import jax
import jax.numpy as jnp
import numpy as np
from jax.experimental import pallas as pl
from jax.experimental.pallas import tpu as pltpu

BN_EPS = 1e-5
LRELU_SLOPE = 0.01          # F.leaky_relu default negative slope
# Matmul operand dtype. Set to jnp.bfloat16 for more MXU throughput / halved
# operand DMA (accumulation stays f32); keep f32 for tight numerical parity.
MATMUL_DTYPE = jnp.float32

_PARALLEL = pltpu.CompilerParams(dimension_semantics=("parallel",))


def _mxu_dot(a, b):
    return jnp.dot(a.astype(MATMUL_DTYPE), b.astype(MATMUL_DTYPE),
                   preferred_element_type=jnp.float32)


def _conv_taps(x_ref, w_ref, shifts, out_len):
    """KxK conv on the flat padded grid as a sum of statically shifted matmuls.

    x_ref : (1, Cin, L)  per-sample flat-padded activations (lanes = flat spatial)
    w_ref : (K*K, Cout, Cin) resident tap weights
    returns (Cout, out_len) float32
    """
    acc = _mxu_dot(w_ref[0], x_ref[0, :, shifts[0]:shifts[0] + out_len])
    for t in range(1, len(shifts)):
        acc = acc + _mxu_dot(w_ref[t], x_ref[0, :, shifts[t]:shifts[t] + out_len])
    return acc


def _make_stats_kernel(shifts, out_len):
    # pass 1 of BN: masked per-channel sum and sum-of-squares of the conv output
    def kernel(x_ref, w_ref, mask_ref, stats_ref):
        y = _conv_taps(x_ref, w_ref, shifts, out_len)              # (Cout, L0)
        valid = mask_ref[...] > 0.5                                 # (1, L0)
        ym = jnp.where(valid, y, 0.0)
        stats_ref[0, :, 0:1] = jnp.sum(ym, axis=1, keepdims=True)
        stats_ref[0, :, 1:2] = jnp.sum(ym * y, axis=1, keepdims=True)
    return kernel


def _make_apply_kernel(shifts, out_len):
    # pass 2: conv -> y*scale+shift -> LeakyReLU, masked to the valid positions
    # so the wrapper turns it directly into the next conv's zero-padded input.
    def kernel(x_ref, w_ref, ab_ref, mask_ref, o_ref):
        y = _conv_taps(x_ref, w_ref, shifts, out_len)
        z = y * ab_ref[0] + ab_ref[1]
        z = jnp.where(z >= 0.0, z, LRELU_SLOPE * z)
        o_ref[0] = jnp.where(mask_ref[...] > 0.5, z, 0.0)
    return kernel


def _make_apply_skip_kernel(shifts, out_len, skip_off):
    # pass 2 with the 1x1 skip conv fused: the skip is just one more static tap
    # on the original input's per-sample tile (shared tile, resident weights).
    def kernel(x_ref, w_ref, ab_ref, x0_ref, ws_ref, o_ref):
        y = _conv_taps(x_ref, w_ref, shifts, out_len)
        z = y * ab_ref[0] + ab_ref[1]
        z = jnp.where(z >= 0.0, z, LRELU_SLOPE * z)
        skip = _mxu_dot(ws_ref[...], x0_ref[0, :, skip_off:skip_off + out_len])
        o_ref[0] = z + skip + ab_ref[2]                 # ab[2] = skip bias
    return kernel


def _make_ds_kernel(n_taps):
    # strided downsampling conv: non-overlapping tap stack prepared in wrapper
    def kernel(t_ref, w_ref, b_ref, o_ref):
        acc = _mxu_dot(w_ref[0], t_ref[0, 0])
        for t in range(1, n_taps):
            acc = acc + _mxu_dot(w_ref[t], t_ref[0, t])
        o_ref[0] = acc + b_ref[...]
    return kernel


def _taps_first(w_oihw):
    """(O, I, kh, kw) -> (kh*kw, O, I): each tap is an MXU-ready (O, I) slab."""
    o, i, kh, kw = w_oihw.shape
    return jnp.transpose(w_oihw, (2, 3, 0, 1)).reshape(kh * kw, o, i).astype(jnp.float32)


def block_forward(x_nchw, params, ksize, pad, ds_ksize, ds_stride):
    """Pallas forward of `block.forward`: returns (xp, xp, x12.size()) in NCHW."""
    if 2 * pad != ksize - 1:
        # TODO(synk): generalize the flat-padded layout reuse to non-'same' convs.
        raise NotImplementedError("block_forward assumes 'same' convs (2*pad == ksize-1)")

    x = x_nchw.astype(jnp.float32)
    N, Cin, H, W = x.shape
    Cout = params["w1"].shape[0]
    k = ksize
    Hp, Wp = H + 2 * pad, W + 2 * pad
    L0 = Hp * Wp                                   # flat padded grid length (lane axis)
    G = max(k - 1, pad) * (Wp + 1)                 # right margin so tap slices stay in-bounds
    L = L0 + G
    shifts = tuple(i * Wp + j for i in range(k) for j in range(k))
    skip_off = pad * (Wp + 1)                      # 1x1 skip == tap at offset (pad, pad)
    count = float(N * H * W)

    # TODO(synk): for very large images, switch to halo-tiled row blocks
    # (manual make_async_copy) instead of one full sample per grid step.
    # VMEM budget (v7x: 64 MiB physical / 32 MiB default scoped): worst call
    # streams (Cout+Cin)*L in + Cout*L0 out, double buffered, + resident weights.
    need = 2 * 4 * ((Cout + Cin) * L + Cout * L0 + k * k * Cout * Cout + 4 * Cout)
    if need > 24 * 1024 * 1024:
        raise ValueError(f"per-sample tile needs ~{need} bytes of VMEM; tile spatially")

    # flat-padded original input: channels on sublanes, padded spatial on lanes
    xpad = jnp.pad(x, ((0, 0), (0, 0), (pad, pad), (pad, pad)))
    x1flat = jnp.pad(xpad.reshape(N, Cin, L0), ((0, 0), (0, 0), (0, G)))

    # validity mask of the padded output grid (real conv outputs live at h<H, w<W)
    hh, ww = np.meshgrid(np.arange(Hp), np.arange(Wp), indexing="ij")
    mask = jnp.asarray(((hh < H) & (ww < W)).astype(np.float32).reshape(1, L0))

    w1t = _taps_first(params["w1"])
    w2t = _taps_first(params["w2"])
    wst = params["wskip"].reshape(Cout, Cin).astype(jnp.float32)
    wdt = _taps_first(params["wds"])

    def conv_stats(xflat, wt):
        cin = xflat.shape[1]
        return pl.pallas_call(
            _make_stats_kernel(shifts, L0),
            out_shape=jax.ShapeDtypeStruct((N, Cout, 2), jnp.float32),
            grid=(N,),
            in_specs=[
                pl.BlockSpec((1, cin, L), lambda n: (n, 0, 0)),
                pl.BlockSpec((k * k, Cout, cin), lambda n: (0, 0, 0)),
                pl.BlockSpec((1, L0), lambda n: (0, 0)),
            ],
            out_specs=pl.BlockSpec((1, Cout, 2), lambda n: (n, 0, 0)),
            compiler_params=_PARALLEL,
        )(xflat, wt, mask)

    def bn_affine(stats, gamma, beta):
        # Conv bias is deliberately omitted from the kernels: it cancels exactly
        # in training-mode batch statistics (mean subtracts it).
        s = jnp.sum(stats[:, :, 0], axis=0)
        ss = jnp.sum(stats[:, :, 1], axis=0)
        mean = s / count
        var = ss / count - mean * mean
        scale = gamma.astype(jnp.float32) * jax.lax.rsqrt(var + BN_EPS)
        shift = beta.astype(jnp.float32) - mean * scale
        return scale, shift

    def conv_bn_lrelu(xflat, wt, scale, shift):
        cin = xflat.shape[1]
        ab = jnp.stack([scale, shift], axis=0).reshape(2, Cout, 1)
        return pl.pallas_call(
            _make_apply_kernel(shifts, L0),
            out_shape=jax.ShapeDtypeStruct((N, Cout, L0), jnp.float32),
            grid=(N,),
            in_specs=[
                pl.BlockSpec((1, cin, L), lambda n: (n, 0, 0)),
                pl.BlockSpec((k * k, Cout, cin), lambda n: (0, 0, 0)),
                pl.BlockSpec((2, Cout, 1), lambda n: (0, 0, 0)),
                pl.BlockSpec((1, L0), lambda n: (0, 0)),
            ],
            out_specs=pl.BlockSpec((1, Cout, L0), lambda n: (n, 0, 0)),
            compiler_params=_PARALLEL,
        )(xflat, wt, ab, mask)

    def conv_bn_lrelu_skip(xflat, wt, scale, shift, x0flat, ws, bskip):
        cin = xflat.shape[1]
        cin0 = x0flat.shape[1]
        ab = jnp.stack([scale, shift, bskip.astype(jnp.float32)],
                       axis=0).reshape(3, Cout, 1)
        return pl.pallas_call(
            _make_apply_skip_kernel(shifts, L0, skip_off),
            out_shape=jax.ShapeDtypeStruct((N, Cout, L0), jnp.float32),
            grid=(N,),
            in_specs=[
                pl.BlockSpec((1, cin, L), lambda n: (n, 0, 0)),
                pl.BlockSpec((k * k, Cout, cin), lambda n: (0, 0, 0)),
                pl.BlockSpec((3, Cout, 1), lambda n: (0, 0, 0)),
                pl.BlockSpec((1, cin0, L), lambda n: (n, 0, 0)),
                pl.BlockSpec((Cout, cin0), lambda n: (0, 0)),
            ],
            out_specs=pl.BlockSpec((1, Cout, L0), lambda n: (n, 0, 0)),
            compiler_params=_PARALLEL,
        )(xflat, wt, ab, x0flat, ws)

    # ---- stage 1: conv1 -> bn1 (batch stats) -> leaky_relu ------------------ #
    st1 = conv_stats(x1flat, w1t)
    sc1, sh1 = bn_affine(st1, params["g1"], params["be1"])
    x11m = conv_bn_lrelu(x1flat, w1t, sc1, sh1)          # masked, on padded grid
    # the masked padded-grid output becomes stage-2's zero-padded flat input
    # with a single cheap pad (no crop/re-pad round trip of the activation).
    x2flat = jnp.pad(x11m, ((0, 0), (0, 0), (skip_off, G - skip_off)))

    # ---- stage 2: conv2 -> bn2 -> leaky_relu, += 1x1 skip(x) ---------------- #
    st2 = conv_stats(x2flat, w2t)
    sc2, sh2 = bn_affine(st2, params["g2"], params["be2"])
    y2 = conv_bn_lrelu_skip(x2flat, w2t, sc2, sh2, x1flat, wst, params["bskip"])
    x12 = y2.reshape(N, Cout, Hp, Wp)[:, :, :H, :W]

    # ---- ds conv (strided, no pad) ------------------------------------------ #
    dk, ds = ds_ksize, ds_stride
    Ho = (H - dk) // ds + 1
    Wo = (W - dk) // ds + 1
    taps = [x12[:, :, i:i + ds * (Ho - 1) + 1:ds, j:j + ds * (Wo - 1) + 1:ds]
            for i in range(dk) for j in range(dk)]
    tds = jnp.stack(taps, axis=1).reshape(N, dk * dk, Cout, Ho * Wo)
    bds = params["bds"].reshape(Cout, 1).astype(jnp.float32)

    xp = pl.pallas_call(
        _make_ds_kernel(dk * dk),
        out_shape=jax.ShapeDtypeStruct((N, Cout, Ho * Wo), jnp.float32),
        grid=(N,),
        in_specs=[
            pl.BlockSpec((1, dk * dk, Cout, Ho * Wo), lambda n: (n, 0, 0, 0)),
            pl.BlockSpec((dk * dk, Cout, Cout), lambda n: (0, 0, 0)),
            pl.BlockSpec((Cout, 1), lambda n: (0, 0)),
        ],
        out_specs=pl.BlockSpec((1, Cout, Ho * Wo), lambda n: (n, 0, 0)),
        compiler_params=_PARALLEL,
    )(tds, wdt, bds).reshape(N, Cout, Ho, Wo)

    # TODO(synk): BatchNorm2d running_mean/running_var momentum updates are a
    # stateful training side-effect with no forward-output dependence; not reproduced.
    x12_size = (N, Cout, H, W)
    return xp, xp, x12_size


# ---------------------------- pure-JAX reference ---------------------------- #
def ref_forward(x_nchw, p, ksize, pad, ds_ksize, ds_stride):
    x = x_nchw.astype(jnp.float32)

    def conv(inp, w, b, stride=1, padv=0):
        y = jax.lax.conv_general_dilated(
            inp, w, (stride, stride), [(padv, padv), (padv, padv)],
            dimension_numbers=("NCHW", "OIHW", "NCHW"),
            precision=jax.lax.Precision.HIGHEST)
        return y + b.reshape(1, -1, 1, 1)

    def bn(y, g, be):
        m = jnp.mean(y, axis=(0, 2, 3), keepdims=True)
        v = jnp.mean((y - m) ** 2, axis=(0, 2, 3), keepdims=True)
        return ((y - m) * jax.lax.rsqrt(v + BN_EPS) * g.reshape(1, -1, 1, 1)
                + be.reshape(1, -1, 1, 1))

    lrelu = lambda z: jnp.where(z >= 0.0, z, LRELU_SLOPE * z)

    x11 = lrelu(bn(conv(x, p["w1"], p["b1"], padv=pad), p["g1"], p["be1"]))
    x12 = lrelu(bn(conv(x11, p["w2"], p["b2"], padv=pad), p["g2"], p["be2"]))
    x12 = x12 + conv(x, p["wskip"], p["bskip"])
    xp = conv(x12, p["wds"], p["bds"], stride=ds_stride)
    return xp, x12


if __name__ == "__main__":
    # block(inp=4, out=8, ksize=3, pad=1, ds_ksize=2, ds_stride=2) on (2, 4, 16, 16).
    N, Cin, Cout, H, W = 2, 4, 8, 16, 16
    ksize, pad, ds_ksize, ds_stride = 3, 1, 2, 2

    key = jax.random.PRNGKey(0)
    ks = jax.random.split(key, 12)
    params = {
        "w1": 0.1 * jax.random.normal(ks[0], (Cout, Cin, ksize, ksize), jnp.float32),
        "b1": 0.1 * jax.random.normal(ks[1], (Cout,), jnp.float32),
        "g1": 1.0 + 0.1 * jax.random.normal(ks[2], (Cout,), jnp.float32),
        "be1": 0.1 * jax.random.normal(ks[3], (Cout,), jnp.float32),
        "w2": 0.1 * jax.random.normal(ks[4], (Cout, Cout, ksize, ksize), jnp.float32),
        "b2": 0.1 * jax.random.normal(ks[5], (Cout,), jnp.float32),
        "g2": 1.0 + 0.1 * jax.random.normal(ks[6], (Cout,), jnp.float32),
        "be2": 0.1 * jax.random.normal(ks[7], (Cout,), jnp.float32),
        "wskip": 0.1 * jax.random.normal(ks[8], (Cout, Cin, 1, 1), jnp.float32),
        "bskip": 0.1 * jax.random.normal(ks[9], (Cout,), jnp.float32),
        "wds": 0.1 * jax.random.normal(ks[10], (Cout, Cout, ds_ksize, ds_ksize), jnp.float32),
        "bds": 0.1 * jax.random.normal(ks[11], (Cout,), jnp.float32),
    }
    x = jax.random.normal(jax.random.PRNGKey(42), (N, Cin, H, W), jnp.float32)

    xp1, xp2, x12_size = block_forward(x, params, ksize, pad, ds_ksize, ds_stride)
    jax.block_until_ready(xp1)

    xp_ref, x12_ref = ref_forward(x, params, ksize, pad, ds_ksize, ds_stride)
    np.testing.assert_allclose(np.asarray(xp1), np.asarray(xp_ref), rtol=5e-3, atol=5e-3)
    np.testing.assert_allclose(np.asarray(xp2), np.asarray(xp_ref), rtol=5e-3, atol=5e-3)
    assert tuple(x12_size) == (N, Cout, H, W)
    assert xp1.shape == (N, Cout, (H - ds_ksize) // ds_stride + 1,
                         (W - ds_ksize) // ds_stride + 1)

    print("KERNEL_OK")
</pallas_src>

<mosaic_0001>
module attributes {stable_mosaic.version = 11 : i64} {
  func.func @kernel(%arg0: i32, %arg1: memref<1x4x362xf32, #tpu.memory_space<vmem>>, %arg2: memref<9x8x4xf32, #tpu.memory_space<vmem>>, %arg3: memref<1x324xf32, #tpu.memory_space<vmem>>, %arg4: memref<1x8x2xf32, #tpu.memory_space<vmem>>) attributes {dimension_semantics = [#tpu.dimension_semantics<parallel>], iteration_bounds = array<i64: 2>, scalar_prefetch = 0 : i64, scratch_operands = 0 : i64, tpu.core_type = #tpu.core_type<tc>, window_params = [{transform_indices = @transform_0, window_bounds = array<i64: 1, 4, 362>}, {pipeline_mode = #tpu.pipeline_mode<synchronous>, transform_indices = @transform_1, window_bounds = array<i64: 9, 8, 4>}, {pipeline_mode = #tpu.pipeline_mode<synchronous>, transform_indices = @transform_2, window_bounds = array<i64: 1, 324>}, {transform_indices = @transform_3, window_bounds = array<i64: 1, 8, 2>}]} {
    %c0 = arith.constant 0 : index
    %c0_0 = arith.constant 0 : index
    %c0_1 = arith.constant 0 : index
    %0 = vector.load %arg2[%c0, %c0_0, %c0_1] : memref<9x8x4xf32, #tpu.memory_space<vmem>>, vector<1x8x4xf32>
    %1 = vector.shape_cast %0 : vector<1x8x4xf32> to vector<8x4xf32>
    %c0_2 = arith.constant 0 : index
    %c0_3 = arith.constant 0 : index
    %c0_4 = arith.constant 0 : index
    %2 = vector.load %arg1[%c0_2, %c0_3, %c0_4] : memref<1x4x362xf32, #tpu.memory_space<vmem>>, vector<1x4x324xf32>
    %3 = vector.shape_cast %2 : vector<1x4x324xf32> to vector<4x324xf32>
    %cst = arith.constant dense<0.000000e+00> : vector<8x324xf32>
    %4 = tpu.matmul %1, %3, %cst {dimension_numbers = #tpu.dot_dimension_numbers<[1], [0], [0], [1], [0, 0, 1, 1], [], []>} : vector<8x4xf32>, vector<4x324xf32>, vector<8x324xf32> -> vector<8x324xf32>
    %c1 = arith.constant 1 : index
    %c0_5 = arith.constant 0 : index
    %c0_6 = arith.constant 0 : index
    %5 = vector.load %arg2[%c1, %c0_5, %c0_6] : memref<9x8x4xf32, #tpu.memory_space<vmem>>, vector<1x8x4xf32>
    %6 = vector.shape_cast %5 : vector<1x8x4xf32> to vector<8x4xf32>
    %c0_7 = arith.constant 0 : index
    %c0_8 = arith.constant 0 : index
    %c1_9 = arith.constant 1 : index
    %7 = vector.load %arg1[%c0_7, %c0_8, %c1_9] : memref<1x4x362xf32, #tpu.memory_space<vmem>>, vector<1x4x324xf32>
    %8 = vector.shape_cast %7 : vector<1x4x324xf32> to vector<4x324xf32>
    %cst_10 = arith.constant dense<0.000000e+00> : vector<8x324xf32>
    %9 = tpu.matmul %6, %8, %cst_10 {dimension_numbers = #tpu.dot_dimension_numbers<[1], [0], [0], [1], [0, 0, 1, 1], [], []>} : vector<8x4xf32>, vector<4x324xf32>, vector<8x324xf32> -> vector<8x324xf32>
    %10 = arith.addf %4, %9 : vector<8x324xf32>
    %c2 = arith.constant 2 : index
    %c0_11 = arith.constant 0 : index
    %c0_12 = arith.constant 0 : index
    %11 = vector.load %arg2[%c2, %c0_11, %c0_12] : memref<9x8x4xf32, #tpu.memory_space<vmem>>, vector<1x8x4xf32>
    %12 = vector.shape_cast %11 : vector<1x8x4xf32> to vector<8x4xf32>
    %c0_13 = arith.constant 0 : index
    %c0_14 = arith.constant 0 : index
    %c2_15 = arith.constant 2 : index
    %13 = vector.load %arg1[%c0_13, %c0_14, %c2_15] : memref<1x4x362xf32, #tpu.memory_space<vmem>>, vector<1x4x324xf32>
    %14 = vector.shape_cast %13 : vector<1x4x324xf32> to vector<4x324xf32>
    %cst_16 = arith.constant dense<0.000000e+00> : vector<8x324xf32>
    %15 = tpu.matmul %12, %14, %cst_16 {dimension_numbers = #tpu.dot_dimension_numbers<[1], [0], [0], [1], [0, 0, 1, 1], [], []>} : vector<8x4xf32>, vector<4x324xf32>, vector<8x324xf32> -> vector<8x324xf32>
    %16 = arith.addf %10, %15 : vector<8x324xf32>
    %c3 = arith.constant 3 : index
    %c0_17 = arith.constant 0 : index
    %c0_18 = arith.constant 0 : index
    %17 = vector.load %arg2[%c3, %c0_17, %c0_18] : memref<9x8x4xf32, #tpu.memory_space<vmem>>, vector<1x8x4xf32>
    %18 = vector.shape_cast %17 : vector<1x8x4xf32> to vector<8x4xf32>
    %c0_19 = arith.constant 0 : index
    %c0_20 = arith.constant 0 : index
    %c18 = arith.constant 18 : index
    %19 = vector.load %arg1[%c0_19, %c0_20, %c18] : memref<1x4x362xf32, #tpu.memory_space<vmem>>, vector<1x4x324xf32>
    %20 = vector.shape_cast %19 : vector<1x4x324xf32> to vector<4x324xf32>
    %cst_21 = arith.constant dense<0.000000e+00> : vector<8x324xf32>
    %21 = tpu.matmul %18, %20, %cst_21 {dimension_numbers = #tpu.dot_dimension_numbers<[1], [0], [0], [1], [0, 0, 1, 1], [], []>} : vector<8x4xf32>, vector<4x324xf32>, vector<8x324xf32> -> vector<8x324xf32>
    %22 = arith.addf %16, %21 : vector<8x324xf32>
    %c4 = arith.constant 4 : index
    %c0_22 = arith.constant 0 : index
    %c0_23 = arith.constant 0 : index
    %23 = vector.load %arg2[%c4, %c0_22, %c0_23] : memref<9x8x4xf32, #tpu.memory_space<vmem>>, vector<1x8x4xf32>
    %24 = vector.shape_cast %23 : vector<1x8x4xf32> to vector<8x4xf32>
    %c0_24 = arith.constant 0 : index
    %c0_25 = arith.constant 0 : index
    %c19 = arith.constant 19 : index
    %25 = vector.load %arg1[%c0_24, %c0_25, %c19] : memref<1x4x362xf32, #tpu.memory_space<vmem>>, vector<1x4x324xf32>
    %26 = vector.shape_cast %25 : vector<1x4x324xf32> to vector<4x324xf32>
    %cst_26 = arith.constant dense<0.000000e+00> : vector<8x324xf32>
    %27 = tpu.matmul %24, %26, %cst_26 {dimension_numbers = #tpu.dot_dimension_numbers<[1], [0], [0], [1], [0, 0, 1, 1], [], []>} : vector<8x4xf32>, vector<4x324xf32>, vector<8x324xf32> -> vector<8x324xf32>
    %28 = arith.addf %22, %27 : vector<8x324xf32>
    %c5 = arith.constant 5 : index
    %c0_27 = arith.constant 0 : index
    %c0_28 = arith.constant 0 : index
    %29 = vector.load %arg2[%c5, %c0_27, %c0_28] : memref<9x8x4xf32, #tpu.memory_space<vmem>>, vector<1x8x4xf32>
    %30 = vector.shape_cast %29 : vector<1x8x4xf32> to vector<8x4xf32>
    %c0_29 = arith.constant 0 : index
    %c0_30 = arith.constant 0 : index
    %c20 = arith.constant 20 : index
    %31 = vector.load %arg1[%c0_29, %c0_30, %c20] : memref<1x4x362xf32, #tpu.memory_space<vmem>>, vector<1x4x324xf32>
    %32 = vector.shape_cast %31 : vector<1x4x324xf32> to vector<4x324xf32>
    %cst_31 = arith.constant dense<0.000000e+00> : vector<8x324xf32>
    %33 = tpu.matmul %30, %32, %cst_31 {dimension_numbers = #tpu.dot_dimension_numbers<[1], [0], [0], [1], [0, 0, 1, 1], [], []>} : vector<8x4xf32>, vector<4x324xf32>, vector<8x324xf32> -> vector<8x324xf32>
    %34 = arith.addf %28, %33 : vector<8x324xf32>
    %c6 = arith.constant 6 : index
    %c0_32 = arith.constant 0 : index
    %c0_33 = arith.constant 0 : index
    %35 = vector.load %arg2[%c6, %c0_32, %c0_33] : memref<9x8x4xf32, #tpu.memory_space<vmem>>, vector<1x8x4xf32>
    %36 = vector.shape_cast %35 : vector<1x8x4xf32> to vector<8x4xf32>
    %c0_34 = arith.constant 0 : index
    %c0_35 = arith.constant 0 : index
    %c36 = arith.constant 36 : index
    %37 = vector.load %arg1[%c0_34, %c0_35, %c36] : memref<1x4x362xf32, #tpu.memory_space<vmem>>, vector<1x4x324xf32>
    %38 = vector.shape_cast %37 : vector<1x4x324xf32> to vector<4x324xf32>
    %cst_36 = arith.constant dense<0.000000e+00> : vector<8x324xf32>
    %39 = tpu.matmul %36, %38, %cst_36 {dimension_numbers = #tpu.dot_dimension_numbers<[1], [0], [0], [1], [0, 0, 1, 1], [], []>} : vector<8x4xf32>, vector<4x324xf32>, vector<8x324xf32> -> vector<8x324xf32>
    %40 = arith.addf %34, %39 : vector<8x324xf32>
    %c7 = arith.constant 7 : index
    %c0_37 = arith.constant 0 : index
    %c0_38 = arith.constant 0 : index
    %41 = vector.load %arg2[%c7, %c0_37, %c0_38] : memref<9x8x4xf32, #tpu.memory_space<vmem>>, vector<1x8x4xf32>
    %42 = vector.shape_cast %41 : vector<1x8x4xf32> to vector<8x4xf32>
    %c0_39 = arith.constant 0 : index
    %c0_40 = arith.constant 0 : index
    %c37 = arith.constant 37 : index
    %43 = vector.load %arg1[%c0_39, %c0_40, %c37] : memref<1x4x362xf32, #tpu.memory_space<vmem>>, vector<1x4x324xf32>
    %44 = vector.shape_cast %43 : vector<1x4x324xf32> to vector<4x324xf32>
    %cst_41 = arith.constant dense<0.000000e+00> : vector<8x324xf32>
    %45 = tpu.matmul %42, %44, %cst_41 {dimension_numbers = #tpu.dot_dimension_numbers<[1], [0], [0], [1], [0, 0, 1, 1], [], []>} : vector<8x4xf32>, vector<4x324xf32>, vector<8x324xf32> -> vector<8x324xf32>
    %46 = arith.addf %40, %45 : vector<8x324xf32>
    %c8 = arith.constant 8 : index
    %c0_42 = arith.constant 0 : index
    %c0_43 = arith.constant 0 : index
    %47 = vector.load %arg2[%c8, %c0_42, %c0_43] : memref<9x8x4xf32, #tpu.memory_space<vmem>>, vector<1x8x4xf32>
    %48 = vector.shape_cast %47 : vector<1x8x4xf32> to vector<8x4xf32>
    %c0_44 = arith.constant 0 : index
    %c0_45 = arith.constant 0 : index
    %c38 = arith.constant 38 : index
    %49 = vector.load %arg1[%c0_44, %c0_45, %c38] : memref<1x4x362xf32, #tpu.memory_space<vmem>>, vector<1x4x324xf32>
    %50 = vector.shape_cast %49 : vector<1x4x324xf32> to vector<4x324xf32>
    %cst_46 = arith.constant dense<0.000000e+00> : vector<8x324xf32>
    %51 = tpu.matmul %48, %50, %cst_46 {dimension_numbers = #tpu.dot_dimension_numbers<[1], [0], [0], [1], [0, 0, 1, 1], [], []>} : vector<8x4xf32>, vector<4x324xf32>, vector<8x324xf32> -> vector<8x324xf32>
    %52 = arith.addf %46, %51 : vector<8x324xf32>
    %c0_47 = arith.constant 0 : index
    %c0_48 = arith.constant 0 : index
    %53 = vector.load %arg3[%c0_47, %c0_48] : memref<1x324xf32, #tpu.memory_space<vmem>>, vector<1x324xf32>
    %cst_49 = arith.constant 5.000000e-01 : f32
    %54 = vector.broadcast %cst_49 : f32 to vector<1x324xf32>
    %55 = arith.cmpf ogt, %53, %54 : vector<1x324xf32>
    %cst_50 = arith.constant 0.000000e+00 : f32
    %56 = vector.shape_cast %55 : vector<1x324xi1> to vector<1x324xi1>
    %57 = vector.broadcast %56 : vector<1x324xi1> to vector<8x324xi1>
    %58 = vector.broadcast %cst_50 : f32 to vector<8x324xf32>
    %59 = arith.select %57, %52, %58 : vector<8x324xi1>, vector<8x324xf32>
    %cst_51 = arith.constant dense<0.000000e+00> : vector<8xf32>
    %60 = vector.multi_reduction <add>, %59, %cst_51 [1] : vector<8x324xf32> to vector<8xf32>
    %61 = vector.shape_cast %60 : vector<8xf32> to vector<8x1xf32>
    %c0_52 = arith.constant 0 : index
    %c0_53 = arith.constant 0 : index
    %c0_54 = arith.constant 0 : index
    %62 = vector.load %arg4[%c0_52, %c0_53, %c0_54] : memref<1x8x2xf32, #tpu.memory_space<vmem>>, vector<1x8x1xf32>
    %63 = vector.shape_cast %62 : vector<1x8x1xf32> to vector<8x1xf32>
    %64 = vector.shape_cast %61 : vector<8x1xf32> to vector<1x8x1xf32>
    tpu.vector_store %arg4[%c0_52, %c0_53, %c0_54], %64 {strides = array<i32>} : memref<1x8x2xf32, #tpu.memory_space<vmem>>, vector<1x8x1xf32>,
    %65 = arith.mulf %59, %52 : vector<8x324xf32>
    %cst_55 = arith.constant dense<0.000000e+00> : vector<8xf32>
    %66 = vector.multi_reduction <add>, %65, %cst_55 [1] : vector<8x324xf32> to vector<8xf32>
    %67 = vector.shape_cast %66 : vector<8xf32> to vector<8x1xf32>
    %c0_56 = arith.constant 0 : index
    %c0_57 = arith.constant 0 : index
    %c1_58 = arith.constant 1 : index
    %68 = vector.load %arg4[%c0_56, %c0_57, %c1_58] : memref<1x8x2xf32, #tpu.memory_space<vmem>>, vector<1x8x1xf32>
    %69 = vector.shape_cast %68 : vector<1x8x1xf32> to vector<8x1xf32>
    %70 = vector.shape_cast %67 : vector<8x1xf32> to vector<1x8x1xf32>
    tpu.vector_store %arg4[%c0_56, %c0_57, %c1_58], %70 {strides = array<i32>} : memref<1x8x2xf32, #tpu.memory_space<vmem>>, vector<1x8x1xf32>,
    return
  }
  func.func @transform_0(%arg0: i32) -> (i32, i32, i32) {
    %c0_i32 = arith.constant 0 : i32
    %c0_i32_0 = arith.constant 0 : i32
    %c0_i32_1 = arith.constant 0 : i32
    return %arg0, %c0_i32, %c0_i32_0 : i32, i32, i32
  }
  func.func @transform_1(%arg0: i32) -> (i32, i32, i32) {
    %c0_i32 = arith.constant 0 : i32
    %c0_i32_0 = arith.constant 0 : i32
    %c0_i32_1 = arith.constant 0 : i32
    %c0_i32_2 = arith.constant 0 : i32
    return %c0_i32, %c0_i32_0, %c0_i32_1 : i32, i32, i32
  }
  func.func @transform_2(%arg0: i32) -> (i32, i32) {
    %c0_i32 = arith.constant 0 : i32
    %c0_i32_0 = arith.constant 0 : i32
    %c0_i32_1 = arith.constant 0 : i32
    return %c0_i32, %c0_i32_0 : i32, i32
  }
  func.func @transform_3(%arg0: i32) -> (i32, i32, i32) {
    %c0_i32 = arith.constant 0 : i32
    %c0_i32_0 = arith.constant 0 : i32
    %c0_i32_1 = arith.constant 0 : i32
    return %arg0, %c0_i32, %c0_i32_0 : i32, i32, i32
  }
}

</mosaic_0001>

<bundles_post_ra>
// kernel: tpu_custom_call.1
= control target key start
LH: loop header
LB: loop body
LE: loop exit
PB: predicated region body
PF: predicated region fallthrough
CT: control target
= control target key end

     0   :  { %s1197_s12 = smov 0   ;;  %s1337_s0 = inlined_call_operand.vmem [shape: f32[2,4,362], index: 0, kind: input, shape index: {}]   ;;  %s1338_s1 = inlined_call_operand.vmem [shape: f32[9,8,4], index: 1, kind: input, shape index: {}]   ;;  %s1339_s2 = inlined_call_operand.vmem [shape: f32[1,324], index: 2, kind: input, shape index: {}]   ;;  %s1340_s3 = inlined_call_operand.vmem [shape: f32[2,8,2], index: 3, kind: output, shape index: {}]  }
   0x1 LB: > { %s1071_s13 = sadd.s32 4294967295, %s1166_s12   ;;  %p1075_p0 = scmp.ge.s32.totalorder %s1166_s12, 1  ;;  %s1166_s12 = sphi %s1197_s12, %s13_s12  }
   0x2   : > { %p137_p1 = scmp.lt.s32.totalorder %s1166_s12, 3 }
   0x4   : > { %p138_p2 = pnand %p1075_p0, %p137_p1 }
   0x5   : > { %p160_p3 = scmp.lt.s32.totalorder (!%p138_p2), %s1071_s13, 1  ;;  %s1168_s18 = smov (!%p138_p2), 127  }
   0x6   : > { %141 = sbr.rel (%p138_p2) target bundleno = 465 (0x1d1), region = 32  ;;  %s1169_s19 = smov (!%p138_p2), 126  }
   0x7   : > { %s1170_s20 = smov (!%p138_p2), 110   ;;  %s1171_s21 = smov (!%p138_p2), 109  }
   0x8   : > { %s1172_s22 = smov (!%p138_p2), 108   ;;  %s1173_s23 = smov (!%p138_p2), 92  }
   0x9   : > { %s1174_s24 = smov (!%p138_p2), 91   ;;  %s1175_s25 = smov (!%p138_p2), 90  }
   0xb   : > { %s1342_s13 = smov (!%p160_p3, %s1071_s13), 1  ;;  %vm195_vm0 = vcmask 1043456   ;;  %vm191_vm1 = vcmask 31744   ;;  %v169_v36 = vld [vmem:[%s1338_s1] sm:$0xff]  ;;  %vm188_vm2 = vcmask 1039360   ;;  %v1078_v38 = vld [vmem:[%s1338_s1 + $0x8] sm:$0xff] }
   0xc   : > { %s1142_s14 = smul.u32 12, %s1342_s13  ;;  %vm355_vm3 = vcmask 1031168   ;;  %v1091_v43 = vld [vmem:[%s1338_s1 + $0x10] sm:$0xff]  ;;  %vm448_vm4 = vcmask 900096   ;;  %v1098_v53 = vld [vmem:[%s1338_s1 + $0x18] sm:$0xff]  ;;  %vm541_vm5 = vcmask 891904  }
   0xd   : > { %v1105_v59 = vld [vmem:[%s1338_s1 + $0x20] sm:$0xff]  ;;  %vm634_vm6 = vcmask 883712   ;;  %vm727_vm7 = vcmask 752640   ;;  %vm820_vm8 = vcmask 744448   ;;  %vm913_vm9 = vcmask 736256  }
   0xe   : > { %s1211_s17 = scalar_lea.vmem %s1337_s0, %s1142_s14  ;;  %vm1001_vm14 = vcmask 556032   ;;  %vm1006_vm15 = vcmask 7168  }
   0xf   : > { %v171_v0 = vld [vmem:[%s1211_s17 + $0x8] sm:$0xf]  ;;  %v1215_v1 = vld [vmem:[%s1211_s17] sm:$0xff] }
  0x10   : > { %178 = vst [vmem:[#allocation1 + $0x10] ss:$2 sm:$0xff] %v171_v0  ;;  %v340_v5 = vld [vmem:[%s1211_s17 + $0x8] sm:$0xf] }
  0x11   : > { %176 = vst [vmem:[#allocation1] ss:$2 sm:$0xff] %v1215_v1  ;;  %v433_v9 = vld [vmem:[%s1211_s17 + $0x8] sm:$0xf] }
  0x12   : > { %v526_v13 = vld [vmem:[%s1211_s17 + $0x8] sm:$0xf] }
  0x13   : > { %v619_v17 = vld [vmem:[%s1211_s17 + $0x8] sm:$0xf] }
  0x14   : > { %v712_v21 = vld [vmem:[%s1211_s17 + $0x8] sm:$0xf] }
  0x15   : > { %v805_v25 = vld [vmem:[%s1211_s17 + $0x8] sm:$0xf] }
  0x16   : > { %v898_v29 = vld [vmem:[%s1211_s17 + $0x8] sm:$0xf] }
  0x17   : > { %v181_v2 = vld.sshfl [vmem:[#allocation1 + $0x10] sm:$0xff pattern:$0x75316420] }
  0x18   : > { %186 = vrot.lane.b32.xlu0 %v181_v2, %s1168_s18  ;;  %264 = vst [vmem:[#allocation1 + $0x10] ss:$2 sm:$0xff] %v171_v0  ;;  %v180_v3 = vld.sshfl [vmem:[#allocation1 + $0x8] sm:$0xff pattern:$0x75316420] }
  0x19   : > { %184 = vrot.lane.b32.xlu1 %v180_v3, %s1168_s18  ;;  %v179_v4 = vld.sshfl [vmem:[#allocation1] sm:$0xff pattern:$0x75316420]  ;;  %v1112_v0 = vld [vmem:[%s1338_s1 + $0x28] sm:$0xff] }
  0x1a   : > { %262 = vst [vmem:[#allocation1] ss:$2 sm:$0xff] %v1215_v1 }
  0x1f   : > { %v1220_v6 = vld.sshfl [vmem:[#allocation1 + $0x10] sm:$0xff pattern:$0x75316420] }
  0x20   : > { %182 = vrot.lane.b32.xlu0 %v179_v4, %s1168_s18  ;;  %345 = vst [vmem:[#allocation1 + $0x10] ss:$2 sm:$0xff] %v340_v5 }
  0x21   : > { %v1222_v7 = vld.sshfl [vmem:[#allocation1] sm:$0xff pattern:$0x75316420]  ;;  %v1224_v8 = vld.sshfl [vmem:[#allocation1 + $0x8] sm:$0xff pattern:$0x75316420] }
  0x22   : > { %343 = vst [vmem:[#allocation1] ss:$2 sm:$0xff] %v1215_v1  ;;  %1085 = vmatpush.msk.msra.mxu3 %vm195_vm0, %v1222_v7 }
  0x23   : > { %1086 = vmatmul.msk.f32.vlgmr.msra.gmra.mxu3 %vm191_vm1, %v169_v36 }
  0x27   : > { %v348_v10 = vld.sshfl [vmem:[#allocation1 + $0x10] sm:$0xff pattern:$0x75316420] }
  0x28   : > { %438 = vst [vmem:[#allocation1 + $0x10] ss:$2 sm:$0xff] %v433_v9 }
  0x29   : > { %v346_v11 = vld.sshfl [vmem:[#allocation1] sm:$0xff pattern:$0x75316420]  ;;  %v347_v12 = vld.sshfl [vmem:[#allocation1 + $0x8] sm:$0xff pattern:$0x75316420] }
  0x2a   : > { %349 = vrot.lane.b32.xlu1 %v346_v11, %s1169_s19  ;;  %436 = vst [vmem:[#allocation1] ss:$2 sm:$0xff] %v1215_v1  ;;  %351 = vrot.lane.b32.xlu2 %v347_v12, %s1169_s19  ;;  %v1126_v12 = vld [vmem:[%s1338_s1 + $0x38] sm:$0xff] }
  0x2f   : > { %v441_v14 = vld.sshfl [vmem:[#allocation1 + $0x10] sm:$0xff pattern:$0x75316420] }
  0x30   : > { %531 = vst [vmem:[#allocation1 + $0x10] ss:$2 sm:$0xff] %v526_v13 }
  0x31   : > { %v440_v15 = vld.sshfl [vmem:[#allocation1 + $0x8] sm:$0xff pattern:$0x75316420]  ;;  %v439_v16 = vld.sshfl [vmem:[#allocation1] sm:$0xff pattern:$0x75316420] }
  0x32   : > { %446 = vrot.lane.b32.xlu1 %v441_v14, %s1170_s20  ;;  %444 = vrot.lane.b32.xlu0 %v440_v15, %s1170_s20  ;;  %529 = vst [vmem:[#allocation1] ss:$2 sm:$0xff] %v1215_v1 }
  0x33   : > { %353 = vrot.lane.b32.xlu2 %v348_v10, %s1169_s19 }
  0x37   : > { %v534_v18 = vld.sshfl [vmem:[#allocation1 + $0x10] sm:$0xff pattern:$0x75316420] }
  0x38   : > { %624 = vst [vmem:[#allocation1 + $0x10] ss:$2 sm:$0xff] %v619_v17 }
  0x39   : > { %v533_v19 = vld.sshfl [vmem:[#allocation1 + $0x8] sm:$0xff pattern:$0x75316420]  ;;  %v532_v20 = vld.sshfl [vmem:[#allocation1] sm:$0xff pattern:$0x75316420] }
  0x3a   : > { %539 = vrot.lane.b32.xlu0 %v534_v18, %s1171_s21  ;;  %535 = vrot.lane.b32.xlu1 %v532_v20, %s1171_s21  ;;  %622 = vst [vmem:[#allocation1] ss:$2 sm:$0xff] %v1215_v1  ;;  %v1133_v18 = vld [vmem:[%s1338_s1 + $0x40] sm:$0xff] }
  0x3b   : > { %442 = vrot.lane.b32.xlu2 %v439_v16, %s1170_s20 }
  0x3f   : > { %v627_v22 = vld.sshfl [vmem:[#allocation1 + $0x10] sm:$0xff pattern:$0x75316420] }
  0x40   : > { %717 = vst [vmem:[#allocation1 + $0x10] ss:$2 sm:$0xff] %v712_v21 }
  0x41   : > { %v626_v23 = vld.sshfl [vmem:[#allocation1 + $0x8] sm:$0xff pattern:$0x75316420]  ;;  %v625_v24 = vld.sshfl [vmem:[#allocation1] sm:$0xff pattern:$0x75316420] }
  0x42   : > { %630 = vrot.lane.b32.xlu1 %v626_v23, %s1172_s22  ;;  %628 = vrot.lane.b32.xlu0 %v625_v24, %s1172_s22  ;;  %715 = vst [vmem:[#allocation1] ss:$2 sm:$0xff] %v1215_v1 }
  0x43   : > { %537 = vrot.lane.b32.xlu2 %v533_v19, %s1171_s21  ;;  %s1077_s21 = sshll.u32 %s1342_s13, 3 }
  0x47   : > { %v720_v26 = vld.sshfl [vmem:[#allocation1 + $0x10] sm:$0xff pattern:$0x75316420] }
  0x48   : > { %810 = vst [vmem:[#allocation1 + $0x10] ss:$2 sm:$0xff] %v805_v25 }
  0x49   : > { %v719_v27 = vld.sshfl [vmem:[#allocation1 + $0x8] sm:$0xff pattern:$0x75316420]  ;;  %v718_v28 = vld.sshfl [vmem:[#allocation1] sm:$0xff pattern:$0x75316420] }
  0x4a   : > { %632 = vrot.lane.b32.xlu1 %v627_v22, %s1172_s22  ;;  %723 = vrot.lane.b32.xlu0 %v719_v27, %s1173_s23  ;;  %808 = vst [vmem:[#allocation1] ss:$2 sm:$0xff] %v1215_v1 }
  0x4b   : > { %721 = vrot.lane.b32.xlu2 %v718_v28, %s1173_s23 }
  0x4f   : > { %v813_v30 = vld.sshfl [vmem:[#allocation1 + $0x10] sm:$0xff pattern:$0x75316420] }
  0x50   : > { %903 = vst [vmem:[#allocation1 + $0x10] ss:$2 sm:$0xff] %v898_v29 }
  0x51   : > { %v812_v31 = vld.sshfl [vmem:[#allocation1 + $0x8] sm:$0xff pattern:$0x75316420]  ;;  %v811_v32 = vld.sshfl [vmem:[#allocation1] sm:$0xff pattern:$0x75316420] }
  0x52   : > { %818 = vrot.lane.b32.xlu1 %v813_v30, %s1174_s24  ;;  %816 = vrot.lane.b32.xlu0 %v812_v31, %s1174_s24  ;;  %901 = vst [vmem:[#allocation1] ss:$2 sm:$0xff] %v1215_v1 }
  0x53   : > { %725 = vrot.lane.b32.xlu2 %v720_v26, %s1173_s23 }
  0x57   : > { %v906_v33 = vld.sshfl [vmem:[#allocation1 + $0x10] sm:$0xff pattern:$0x75316420] }
  0x59   : > { %v904_v34 = vld.sshfl [vmem:[#allocation1] sm:$0xff pattern:$0x75316420]  ;;  %v905_v35 = vld.sshfl [vmem:[#allocation1 + $0x8] sm:$0xff pattern:$0x75316420] }
  0x5a   : > { %911 = vrot.lane.b32.xlu0 %v906_v33, %s1175_s25  ;;  %907 = vrot.lane.b32.xlu1 %v904_v34, %s1175_s25 }
  0x5b   : > { %814 = vrot.lane.b32.xlu2 %v811_v32, %s1174_s24  ;;  %s168_s24 = scalar_lea.vmem %s1340_s3, %s1077_s21 }
  0x63   : > { %909 = vrot.lane.b32.xlu2 %v905_v35, %s1175_s25 }
  0x84   : > { %v352_v37 = vpop.permute.xlu2 %351 }
  0x8a   : > { %v187_v39 = vpop.permute.xlu0 %186 }
  0x8b   : > { %v185_v40 = vpop.permute.xlu1 %184  ;;  %1083 = vmatpush.msk.msra.mxu2 %vm195_vm0, %v187_v39 }
  0x8c   : > { %v190_v41 = vsel %vm188_vm2, %v185_v40, %v187_v39  ;;  %1084 = vmatmul.msk.f32.vlgmr.msra.gmra.mxu2 %vm191_vm1, %v1078_v38 }
  0x8d   : > { %1081 = vmatpush.msk.msra.mxu1 %vm195_vm0, %v190_v41  ;;  %v354_v42 = vpop.permute.xlu2 %353 }
  0x8e   : > { %1082 = vmatmul.msk.f32.vlgmr.msra.gmra.mxu1 %vm191_vm1, %v1078_v38  ;;  %v357_v44 = vsel %vm355_vm3, %v352_v37, %v354_v42 }
  0x8f   : > { %1094 = vmatpush.msk.msrb.mxu3 %vm195_vm0, %v357_v44  ;;  %1089 = vmatpush.msk.msrb.mxu1 %vm195_vm0, %v1220_v6 }
  0x90   : > { %1095 = vmatmul.msk.f32.vlgmr.msrb.gmra.mxu3 %vm191_vm1, %v1091_v43 }
  0x92   : > { %v183_v45 = vpop.permute.xlu0 %182 }
  0x93   : > { %v189_v46 = vsel %vm188_vm2, %v183_v45, %v185_v40 }
  0x94   : > { %1079 = vmatpush.msk.msra.mxu0 %vm195_vm0, %v189_v46 }
  0x95   : > { %1080 = vmatmul.msk.f32.vlgmr.msra.gmra.mxu0 %vm191_vm1, %v1078_v38  ;;  %v443_v47 = vpop.permute.xlu2 %442 }
  0x96   : > { %1087 = vmatpush.msk.msrb.mxu0 %vm195_vm0, %v1224_v8  ;;  %1090 = vmatmul.msk.f32.vlgmr.msrb.gmra.mxu1 %vm191_vm1, %v169_v36  ;;  %v1119_v8 = vld [vmem:[%s1338_s1 + $0x30] sm:$0xff] }
  0x98   : > { %1096 = vmatpush.msk.msra.mxu0 %vm195_vm0, %v354_v42 }
  0x9c   : > { %v350_v48 = vpop.permute.xlu1 %349 }
  0x9d   : > { %v356_v49 = vsel %vm355_vm3, %v350_v48, %v352_v37  ;;  %1088 = vmatmul.msk.f32.vlgmr.msrb.gmra.mxu0 %vm191_vm1, %v169_v36  ;;  %v538_v50 = vpop.permute.xlu2 %537 }
  0x9e   : > { %1092 = vmatpush.msk.msrb.mxu2 %vm195_vm0, %v356_v49 }
  0x9f   : > { %1093 = vmatmul.msk.f32.vlgmr.msrb.gmra.mxu2 %vm191_vm1, %v1091_v43 }
  0xa4   : > { %v447_v51 = vpop.permute.xlu1 %446  ;;  %v445_v52 = vpop.permute.xlu0 %444 }
  0xa5   : > { %v450_v54 = vsel %vm448_vm4, %v445_v52, %v447_v51  ;;  %v449_v55 = vsel %vm448_vm4, %v443_v47, %v445_v52  ;;  %1103 = vmatpush.msk.msra.mxu3 %vm195_vm0, %v447_v51  ;;  %1097 = vmatmul.msk.f32.vlgmr.msra.gmra.mxu0 %vm191_vm1, %v1091_v43  ;;  %v722_v56 = vpop.permute.xlu2 %721  ;;  %v988_v43 = vld [vmem:[%s1339_s2] sm:$0x7] }
  0xa6   : > { %1099 = vmatpush.msk.msra.mxu1 %vm195_vm0, %v449_v55  ;;  %1101 = vmatpush.msk.msra.mxu2 %vm195_vm0, %v450_v54  ;;  %v294_v24 = vpop.f32.mrf.mxu3  ;;  %vm989_vm10 = vcmp.gt.f32.partialorder %v988_v43, 0.5  ;;  %v1176_v54 = vmov 0  }
  0xa7   : > { %1102 = vmatmul.msk.f32.vlgmr.msra.gmra.mxu2 %vm191_vm1, %v1098_v53  ;;  %1100 = vmatmul.msk.f32.vlgmr.msra.gmra.mxu1 %vm191_vm1, %v1098_v53  ;;  %v990_v55 = vsel %vm989_vm10, 1, %v1176_v54 }
  0xa8   : > { %1104 = vmatmul.msk.f32.vlgmr.msra.gmra.mxu3 %vm191_vm1, %v1098_v53 }
  0xac   : > { %v540_v57 = vpop.permute.xlu0 %539  ;;  %v536_v58 = vpop.permute.xlu1 %535 }
  0xad   : > { %v543_v60 = vsel %vm541_vm5, %v538_v50, %v540_v57  ;;  %v542_v61 = vsel %vm541_vm5, %v536_v58, %v538_v50  ;;  %1110 = vmatpush.msk.msrb.mxu2 %vm195_vm0, %v540_v57  ;;  %v726_v2 = vpop.permute.xlu2 %725 }
  0xae   : > { %1106 = vmatpush.msk.msrb.mxu0 %vm195_vm0, %v542_v61  ;;  %1108 = vmatpush.msk.msrb.mxu1 %vm195_vm0, %v543_v60 }
  0xaf   : > { %1111 = vmatmul.msk.f32.vlgmr.msrb.gmra.mxu2 %vm191_vm1, %v1105_v59  ;;  %1107 = vmatmul.msk.f32.vlgmr.msrb.gmra.mxu0 %vm191_vm1, %v1105_v59 }
  0xb0   : > { %1109 = vmatmul.msk.f32.vlgmr.msrb.gmra.mxu1 %vm191_vm1, %v1105_v59  ;;  %v991_v59 = vperm.slane %v990_v55, 0 }
  0xb2   : > { %vm994_vm11 = vcmp.eq.s32.totalorder %v991_v59, 1 }
  0xb4   : > { %v631_v62 = vpop.permute.xlu1 %630  ;;  %v629_v63 = vpop.permute.xlu0 %628 }
  0xb5   : > { %v635_v1 = vsel %vm634_vm6, %v629_v63, %v631_v62  ;;  %v815_v9 = vpop.permute.xlu2 %814 }
  0xb6   : > { %1113 = vmatpush.msk.msrb.mxu3 %vm195_vm0, %v635_v1 }
  0xb7   : > { %1114 = vmatmul.msk.f32.vlgmr.msrb.gmra.mxu3 %vm191_vm1, %v1112_v0 }
  0xbc   : > { %v633_v3 = vpop.permute.xlu1 %632  ;;  %v724_v4 = vpop.permute.xlu0 %723 }
  0xbd   : > { %v636_v5 = vsel %vm634_vm6, %v631_v62, %v633_v3  ;;  %v728_v6 = vsel %vm727_vm7, %v722_v56, %v724_v4  ;;  %v729_v7 = vsel %vm727_vm7, %v724_v4, %v726_v2  ;;  %1117 = vmatpush.msk.msra.mxu1 %vm195_vm0, %v633_v3  ;;  %v910_v15 = vpop.permute.xlu2 %909  ;;  %v992_v62 = vperm.slane %v990_v55, 1 }
  0xbe   : > { %1115 = vmatpush.msk.msra.mxu0 %vm195_vm0, %v636_v5  ;;  %1118 = vmatmul.msk.f32.vlgmr.msra.gmra.mxu1 %vm191_vm1, %v1112_v0 }
  0xbf   : > { %1120 = vmatpush.msk.msra.mxu2 %vm195_vm0, %v728_v6  ;;  %1122 = vmatpush.msk.msra.mxu3 %vm195_vm0, %v729_v7  ;;  %vm995_vm12 = vcmp.eq.s32.totalorder %v992_v62, 1 }
  0xc0   : > { %1116 = vmatmul.msk.f32.vlgmr.msra.gmra.mxu0 %vm191_vm1, %v1112_v0  ;;  %1121 = vmatmul.msk.f32.vlgmr.msra.gmra.mxu2 %vm191_vm1, %v1119_v8 }
  0xc1   : > { %1123 = vmatmul.msk.f32.vlgmr.msra.gmra.mxu3 %vm191_vm1, %v1119_v8  ;;  %1124 = vmatpush.msk.msrb.mxu0 %vm195_vm0, %v726_v2 }
  0xc4   : > { %v819_v10 = vpop.permute.xlu1 %818  ;;  %v817_v11 = vpop.permute.xlu0 %816 }
  0xc5   : > { %v822_v13 = vsel %vm820_vm8, %v817_v11, %v819_v10  ;;  %v821_v14 = vsel %vm820_vm8, %v815_v9, %v817_v11  ;;  %1131 = vmatpush.msk.msrb.mxu3 %vm195_vm0, %v819_v10  ;;  %v993_v9 = vperm.slane %v990_v55, 2 }
  0xc6   : > { %1127 = vmatpush.msk.msrb.mxu1 %vm195_vm0, %v821_v14  ;;  %1129 = vmatpush.msk.msrb.mxu2 %vm195_vm0, %v822_v13 }
  0xc7   : > { %1128 = vmatmul.msk.f32.vlgmr.msrb.gmra.mxu1 %vm191_vm1, %v1126_v12  ;;  %vm996_vm13 = vcmp.eq.s32.totalorder %v993_v9, 1 }
  0xc8   : > { %1125 = vmatmul.msk.f32.vlgmr.msrb.gmra.mxu0 %vm191_vm1, %v1119_v8  ;;  %1130 = vmatmul.msk.f32.vlgmr.msrb.gmra.mxu2 %vm191_vm1, %v1126_v12 }
  0xc9   : > { %1132 = vmatmul.msk.f32.vlgmr.msrb.gmra.mxu3 %vm191_vm1, %v1126_v12 }
  0xcc   : > { %v912_v16 = vpop.permute.xlu0 %911  ;;  %v908_v17 = vpop.permute.xlu1 %907 }
  0xcd   : > { %v915_v19 = vsel %vm913_vm9, %v910_v15, %v912_v16  ;;  %v914_v20 = vsel %vm913_vm9, %v908_v17, %v910_v15  ;;  %1138 = vmatpush.msk.msra.mxu2 %vm195_vm0, %v912_v16 }
  0xce   : > { %1134 = vmatpush.msk.msra.mxu0 %vm195_vm0, %v914_v20  ;;  %1136 = vmatpush.msk.msra.mxu1 %vm195_vm0, %v915_v19  ;;  %vm1016_vm0 = vcmask 15368  }
  0xcf   : > { %1137 = vmatmul.msk.f32.vlgmr.msra.gmra.mxu1 %vm191_vm1, %v1133_v18 }
  0xd0   : > { %1135 = vmatmul.msk.f32.vlgmr.msra.gmra.mxu0 %vm191_vm1, %v1133_v18  ;;  %1139 = vmatmul.msk.f32.vlgmr.msra.gmra.mxu2 %vm191_vm1, %v1133_v18 }
 0x10b   : > { %v239_v21 = vpop.f32.mrf.mxu1 }
 0x10f   : > { %v259_v23 = vpop.f32.mrf.mxu2 }
 0x112   : > { %v219_v22 = vpop.f32.mrf.mxu0 }
 0x113   : > { %v334_v25 = vpop.f32.mrf.mxu1  ;;  %v404_v28 = vpop.f32.mrf.mxu3  ;;  %v295_v35 = vadd.f32 %v294_v24, %v219_v22 }
 0x114   : > { %v335_v47 = vadd.f32 %v334_v25, %v259_v23 }
 0x11a   : > { %v314_v26 = vpop.f32.mrf.mxu0 }
 0x11b   : > { %v315_v39 = vadd.f32 %v314_v26, %v239_v21 }
 0x11d   : > { %v428_v42 = vadd.f32 %v404_v28, %v315_v39 }
 0x122   : > { %v384_v27 = vpop.f32.mrf.mxu2  ;;  %v424_v30 = vpop.f32.mrf.mxu0 }
 0x123   : > { %v427_v41 = vadd.f32 %v384_v27, %v295_v35  ;;  %v429_v56 = vadd.f32 %v424_v30, %v335_v47 }
 0x124   : > { %v477_v29 = vpop.f32.mrf.mxu1 }
 0x125   : > { %v520_v44 = vadd.f32 %v477_v29, %v427_v41 }
 0x12a   : > { %v497_v31 = vpop.f32.mrf.mxu2 }
 0x12b   : > { %v517_v32 = vpop.f32.mrf.mxu3  ;;  %v521_v45 = vadd.f32 %v497_v31, %v428_v42 }
 0x12c   : > { %v570_v34 = vpop.f32.mrf.mxu0  ;;  %v522_v60 = vadd.f32 %v517_v32, %v429_v56 }
 0x12d   : > { %v590_v33 = vpop.f32.mrf.mxu1  ;;  %v613_v48 = vadd.f32 %v570_v34, %v520_v44 }
 0x12e   : > { %v614_v52 = vadd.f32 %v590_v33, %v521_v45 }
 0x132   : > { %v610_v36 = vpop.f32.mrf.mxu2 }
 0x133   : > { %v615_v0 = vadd.f32 %v610_v36, %v522_v60 }
 0x13a   : > { %v663_v37 = vpop.f32.mrf.mxu3 }
 0x13b   : > { %v703_v38 = vpop.f32.mrf.mxu1  ;;  %v706_v53 = vadd.f32 %v663_v37, %v613_v48 }
 0x13c   : > { %v708_v5 = vadd.f32 %v703_v38, %v615_v0 }
 0x13d   : > { %v683_v40 = vpop.f32.mrf.mxu0 }
 0x13e   : > { %v707_v57 = vadd.f32 %v683_v40, %v614_v52 }
 0x143   : > { %v756_v46 = vpop.f32.mrf.mxu2 }
 0x144   : > { %v849_v49 = vpop.f32.mrf.mxu1  ;;  %v776_v50 = vpop.f32.mrf.mxu3  ;;  %v799_v58 = vadd.f32 %v756_v46, %v706_v53 }
 0x145   : > { %v796_v51 = vpop.f32.mrf.mxu0  ;;  %v800_v61 = vadd.f32 %v776_v50, %v707_v57 }
 0x146   : > { %v892_v1 = vadd.f32 %v849_v49, %v799_v58  ;;  %v801_v10 = vadd.f32 %v796_v51, %v708_v5 }
 0x14b   : > { %v869_v63 = vpop.f32.mrf.mxu2 }
 0x14c   : > { %v893_v2 = vadd.f32 %v869_v63, %v800_v61  ;;  %v962_v3 = vpop.f32.mrf.mxu1  ;;  %v889_v8 = vpop.f32.mrf.mxu3 }
 0x14d   : > { %v942_v4 = vpop.f32.mrf.mxu0  ;;  %v894_v13 = vadd.f32 %v889_v8, %v801_v10 }
 0x14e   : > { %v985_v6 = vadd.f32 %v942_v4, %v892_v1  ;;  %v986_v7 = vadd.f32 %v962_v3, %v893_v2 }
 0x150   : > { %v997_v11 = vsel %vm994_vm11, %v985_v6, 0.0  ;;  %v998_v12 = vsel %vm995_vm12, %v986_v7, 0.0 }
 0x151   : > { %v1008_v15 = vmul.f32 %v997_v11, %v985_v6  ;;  %v1009_v16 = vmul.f32 %v998_v12, %v986_v7  ;;  %v1000_v19 = vadd.f32 %v998_v12, %v997_v11 }
 0x153   : > { %v982_v14 = vpop.f32.mrf.mxu2  ;;  %v1011_v23 = vadd.f32 %v1009_v16, %v1008_v15 }
 0x154   : > { %v987_v17 = vadd.f32 %v982_v14, %v894_v13 }
 0x156   : > { %v999_v18 = vsel %vm996_vm13, %v987_v17, 0.0 }
 0x157   : > { %v1010_v20 = vmul.f32 %v999_v18, %v987_v17  ;;  %v1002_v21 = vsel %vm1001_vm14, %v999_v18, 0.0 }
 0x158   : > { %v1003_v22 = vadd.f32 %v1002_v21, %v1000_v19 }
 0x159   : > { %v1012_v24 = vsel %vm1001_vm14, %v1010_v20, 0.0 }
 0x15a   : > { %1004 = vadd.xlane.f32.xlu0 %v1003_v22  ;;  %v1013_v25 = vadd.f32 %v1012_v24, %v1011_v23 }
 0x15c   : > { %1014 = vadd.xlane.f32.xlu1 %v1013_v25 }
 0x1cd   : > { %v1005_v26 = vpop.xlane.xlu0 %1004 }
 0x1ce   : > { %1007 = vst.msk [vmem:[%s168_s24] sm:$0xff] %vm1006_vm15, %v1005_v26 }
 0x1cf   : > { %v1015_v27 = vpop.xlane.xlu1 %1014 }
 0x1d0   : > { %1017 = vst.msk [vmem:[%s168_s24] sm:$0xff] %vm1016_vm0, %v1015_v27 }
 0x1d1 PF: > { %s13_s12 = sadd.s32 1, %s1166_s12  }
 0x1d2   : > { %p10_p4 = scmp.ge.s32.totalorder %s13_s12, 4  }
 0x1d4   :  { %12 = sbr.rel (!%p10_p4) target bundleno = 1 (0x1), region = 79 }

</bundles_post_ra>
